<compile_context>
chip_gen: v7x
topology: tpu7x:2x2x1
jax: 0.10.0
libtpu: 0.0.40
codegen_flags: <defaults>
</compile_context>

<pallas_src>
import functools

import jax
import jax.numpy as jnp
from jax.experimental import pallas as pl
from jax.experimental.pallas import tpu as pltpu

LANES = 128
SUBLANES = 8


def _cdiv(a, b):
    return (a + b - 1) // b


def _round_up(a, b):
    return _cdiv(a, b) * b


def _default_num_splits():
    """2 core-splits on v7x (two TensorCores per chip), else 1."""
    try:
        kind = jax.devices()[0].device_kind
        if "7" in kind:
            return 2
    except Exception:
        pass
    return 1


def _focal_kernel(x_ref, t_ref, out_ref, *, alpha, gamma, n_elems, tile_rows,
                  tiles_per_split, needs_mask):
    c = pl.program_id(0)            # core-split index ("parallel")
    i = pl.program_id(1)            # tile index within the split (reduction)
    blk = c * tiles_per_split + i   # global tile index

    @pl.when(i == 0)
    def _():
        out_ref[...] = jnp.zeros_like(out_ref)

    x = x_ref[...].astype(jnp.float32)
    t = t_ref[...].astype(jnp.float32)

    # Numerically stable BCE with logits (== F.binary_cross_entropy_with_logits):
    #   ce = max(x, 0) - x*t + log1p(exp(-|x|))
    ce = jnp.maximum(x, 0.0) - x * t + jnp.log1p(jnp.exp(-jnp.abs(x)))
    one_minus_pt = 1.0 - jnp.exp(-ce)

    g = float(gamma)
    if g == 2.0:
        mod = one_minus_pt * one_minus_pt      # VPU multiply, no pow
    elif g == 1.0:
        mod = one_minus_pt
    elif g == 0.0:
        mod = jnp.ones_like(one_minus_pt)
    else:
        # TODO(synk): non-integer gamma falls back to pow (exp/log on the EUP).
        mod = one_minus_pt ** g

    focal = alpha * mod * ce

    def accumulate(vals):
        # (tile_rows, 128) -> (8, 128): sublane-group partial sum (plain VPU
        # adds); the expensive cross-lane reduce happens once, in the wrapper.
        partial = vals.reshape(tile_rows // SUBLANES, SUBLANES, LANES).sum(axis=0)
        out_ref[...] += partial[None, :, :]

    if needs_mask:
        tile_start = blk * (tile_rows * LANES)
        tile_is_ragged = tile_start + tile_rows * LANES > n_elems

        @pl.when(jnp.logical_not(tile_is_ragged))
        def _():
            accumulate(focal)                    # fast path: interior tiles

        @pl.when(tile_is_ragged)
        def _():
            row_ids = jax.lax.broadcasted_iota(jnp.int32, (tile_rows, LANES), 0)
            lane_ids = jax.lax.broadcasted_iota(jnp.int32, (tile_rows, LANES), 1)
            flat_idx = tile_start + row_ids * LANES + lane_ids
            accumulate(jnp.where(flat_idx < n_elems, focal, 0.0))
    else:
        accumulate(focal)


def focal_loss(inputs, targets, alpha=1.5, gamma=2, *, max_tile_rows=4096,
               num_splits=None):
    """Mean-reduced focal loss over all elements; inputs/targets: any shape."""
    assert inputs.shape == targets.shape
    n_elems = int(inputs.size)
    assert n_elems > 0

    x = inputs.reshape(-1)          # keep original dtype; cast inside kernel
    t = targets.reshape(-1)

    if n_elems % LANES != 0:
        # Rare path: pad only to the next (8*128)-multiple so the slab is a
        # clean multiple of the vreg tile.  Padded elements are masked in-kernel.
        total = _round_up(n_elems, LANES * SUBLANES)
        x = jnp.pad(x, (0, total - n_elems))
        t = jnp.pad(t, (0, total - n_elems))
    else:
        total = n_elems             # zero-copy: reshape only

    rows = total // LANES
    x2 = x.reshape(rows, LANES)
    t2 = t.reshape(rows, LANES)

    if num_splits is None:
        num_splits = _default_num_splits()
    num_splits = max(1, min(int(num_splits), _cdiv(rows, SUBLANES)))

    # Balanced tile size: avoid a last tile that is mostly padding while
    # staying <= max_tile_rows (2 MiB/block at 4096 rows of f32).
    rows_per_split_needed = _cdiv(rows, num_splits)
    n_chunks = _cdiv(rows_per_split_needed, int(max_tile_rows))
    tile_rows = max(SUBLANES,
                    _round_up(_cdiv(rows_per_split_needed, n_chunks), SUBLANES))
    tiles_per_split = _cdiv(rows_per_split_needed, tile_rows)

    coverage_rows = num_splits * tiles_per_split * tile_rows
    needs_mask = coverage_rows * LANES > n_elems

    kernel = functools.partial(
        _focal_kernel, alpha=float(alpha), gamma=float(gamma), n_elems=n_elems,
        tile_rows=tile_rows, tiles_per_split=tiles_per_split,
        needs_mask=bool(needs_mask))

    in_map = lambda c, i: (c * tiles_per_split + i, 0)

    bytes_accessed = (rows * LANES * (x2.dtype.itemsize + t2.dtype.itemsize)
                      + num_splits * SUBLANES * LANES * 4)
    cost = pl.CostEstimate(flops=10 * n_elems,
                           transcendentals=3 * n_elems,
                           bytes_accessed=bytes_accessed)

    partials = pl.pallas_call(
        kernel,
        out_shape=jax.ShapeDtypeStruct((num_splits, SUBLANES, LANES), jnp.float32),
        grid_spec=pltpu.PrefetchScalarGridSpec(
            num_scalar_prefetch=0,
            grid=(num_splits, tiles_per_split),
            in_specs=[
                pl.BlockSpec((tile_rows, LANES), in_map),
                pl.BlockSpec((tile_rows, LANES), in_map),
            ],
            out_specs=pl.BlockSpec((1, SUBLANES, LANES), lambda c, i: (c, 0, 0)),
        ),
        compiler_params=pltpu.CompilerParams(
            dimension_semantics=("parallel", "arbitrary")),
        cost_estimate=cost,
    )(x2, t2)

    # Tiny final reduce + mean outside the kernel (num_splits * 8 * 128 elems).
    return jnp.sum(partials) / jnp.float32(n_elems)


def _focal_loss_ref(inputs, targets, alpha=1.5, gamma=2):
    x = inputs.astype(jnp.float32)
    t = targets.astype(jnp.float32)
    ce = jnp.maximum(x, 0.0) - x * t + jnp.log1p(jnp.exp(-jnp.abs(x)))
    pt = jnp.exp(-ce)
    return jnp.mean(alpha * (1.0 - pt) ** gamma * ce)


if __name__ == "__main__":
    key = jax.random.PRNGKey(0)
    k1, k2 = jax.random.split(key)

    # NCHW inputs, matching the PyTorch module's expected usage.
    shape = (2, 4, 16, 16)
    logits = jax.random.normal(k1, shape, dtype=jnp.float32)
    targets = (jax.random.uniform(k2, shape) > 0.5).astype(jnp.float32)

    loss = focal_loss(logits, targets, alpha=1.5, gamma=2)
    loss = jax.block_until_ready(loss)
    ref = _focal_loss_ref(logits, targets, alpha=1.5, gamma=2)
    assert jnp.allclose(loss, ref, rtol=1e-5, atol=1e-6), (loss, ref)

    # Also exercise the ragged / in-kernel-mask path (size not a multiple of 128).
    shape2 = (2, 3, 7, 5)
    k3, k4 = jax.random.split(k1)
    logits2 = jax.random.normal(k3, shape2, dtype=jnp.float32)
    targets2 = (jax.random.uniform(k4, shape2) > 0.5).astype(jnp.float32)
    loss2 = jax.block_until_ready(focal_loss(logits2, targets2))
    ref2 = _focal_loss_ref(logits2, targets2)
    assert jnp.allclose(loss2, ref2, rtol=1e-5, atol=1e-6), (loss2, ref2)

    print("KERNEL_OK")
</pallas_src>

<mosaic_0001>
module attributes {stable_mosaic.version = 11 : i64} {
  func.func @_focal_kernel(%arg0: i32, %arg1: i32, %arg2: memref<16x128xf32, #tpu.memory_space<vmem>>, %arg3: memref<16x128xf32, #tpu.memory_space<vmem>>, %arg4: memref<1x8x128xf32, #tpu.memory_space<vmem>>) attributes {dimension_semantics = [#tpu.dimension_semantics<parallel>, #tpu.dimension_semantics<arbitrary>], iteration_bounds = array<i64: 1, 1>, scalar_prefetch = 0 : i64, scratch_operands = 0 : i64, tpu.core_type = #tpu.core_type<tc>, window_params = [{transform_indices = @transform_0, window_bounds = array<i64: 16, 128>}, {transform_indices = @transform_1, window_bounds = array<i64: 16, 128>}, {transform_indices = @transform_2, window_bounds = array<i64: 1, 8, 128>}]} {
    %c0_i32 = arith.constant 0 : i32
    %0 = arith.cmpi eq, %arg1, %c0_i32 : i32
    %1 = arith.extui %0 : i1 to i32
    %c0_i32_0 = arith.constant 0 : i32
    %2 = arith.cmpi ne, %1, %c0_i32_0 : i32
    scf.if %2 {
      %cst_15 = arith.constant 0.000000e+00 : f32
      %30 = vector.broadcast %cst_15 : f32 to vector<1x8x128xf32>
      %c0_16 = arith.constant 0 : index
      %c0_17 = arith.constant 0 : index
      %c0_18 = arith.constant 0 : index
      %31 = vector.load %arg4[%c0_16, %c0_17, %c0_18] : memref<1x8x128xf32, #tpu.memory_space<vmem>>, vector<1x8x128xf32>
      tpu.vector_store %arg4[%c0_16, %c0_17, %c0_18], %30 {strides = array<i32>} : memref<1x8x128xf32, #tpu.memory_space<vmem>>, vector<1x8x128xf32>,
    } else {
    }
    %c0 = arith.constant 0 : index
    %c0_1 = arith.constant 0 : index
    %3 = vector.load %arg2[%c0, %c0_1] : memref<16x128xf32, #tpu.memory_space<vmem>>, vector<16x128xf32>
    %c0_2 = arith.constant 0 : index
    %c0_3 = arith.constant 0 : index
    %4 = vector.load %arg3[%c0_2, %c0_3] : memref<16x128xf32, #tpu.memory_space<vmem>>, vector<16x128xf32>
    %cst = arith.constant 0.000000e+00 : f32
    %5 = vector.broadcast %cst : f32 to vector<16x128xf32>
    %6 = arith.maximumf %3, %5 : vector<16x128xf32>
    %7 = arith.mulf %3, %4 : vector<16x128xf32>
    %8 = arith.subf %6, %7 : vector<16x128xf32>
    %9 = math.absf %3 : vector<16x128xf32>
    %cst_4 = arith.constant 0.000000e+00 : f32
    %10 = vector.broadcast %cst_4 : f32 to vector<16x128xf32>
    %11 = arith.subf %10, %9 : vector<16x128xf32>
    %12 = math.exp %11 : vector<16x128xf32>
    %13 = math.log1p %12 : vector<16x128xf32>
    %14 = arith.addf %8, %13 : vector<16x128xf32>
    %cst_5 = arith.constant 0.000000e+00 : f32
    %15 = vector.broadcast %cst_5 : f32 to vector<16x128xf32>
    %16 = arith.subf %15, %14 : vector<16x128xf32>
    %17 = math.exp %16 : vector<16x128xf32>
    %cst_6 = arith.constant 1.000000e+00 : f32
    %18 = vector.broadcast %cst_6 : f32 to vector<16x128xf32>
    %19 = arith.subf %18, %17 : vector<16x128xf32>
    %20 = arith.mulf %19, %19 : vector<16x128xf32>
    %cst_7 = arith.constant 1.500000e+00 : f32
    %21 = vector.broadcast %cst_7 : f32 to vector<16x128xf32>
    %22 = arith.mulf %21, %20 : vector<16x128xf32>
    %23 = arith.mulf %22, %14 : vector<16x128xf32>
    %24 = vector.shape_cast %23 : vector<16x128xf32> to vector<2x8x128xf32>
    %cst_8 = arith.constant dense<0.000000e+00> : vector<8x128xf32>
    %25 = vector.multi_reduction <add>, %24, %cst_8 [0] : vector<2x8x128xf32> to vector<8x128xf32>
    %c0_9 = arith.constant 0 : index
    %c0_10 = arith.constant 0 : index
    %c0_11 = arith.constant 0 : index
    %26 = vector.load %arg4[%c0_9, %c0_10, %c0_11] : memref<1x8x128xf32, #tpu.memory_space<vmem>>, vector<1x8x128xf32>
    %27 = vector.shape_cast %25 : vector<8x128xf32> to vector<1x8x128xf32>
    %28 = arith.addf %26, %27 : vector<1x8x128xf32>
    %c0_12 = arith.constant 0 : index
    %c0_13 = arith.constant 0 : index
    %c0_14 = arith.constant 0 : index
    %29 = vector.load %arg4[%c0_12, %c0_13, %c0_14] : memref<1x8x128xf32, #tpu.memory_space<vmem>>, vector<1x8x128xf32>
    tpu.vector_store %arg4[%c0_12, %c0_13, %c0_14], %28 {strides = array<i32>} : memref<1x8x128xf32, #tpu.memory_space<vmem>>, vector<1x8x128xf32>,
    return
  }
  func.func @transform_0(%arg0: i32, %arg1: i32) -> (i32, i32) {
    %c1_i32 = arith.constant 1 : i32
    %0 = arith.muli %arg0, %c1_i32 : i32
    %1 = arith.addi %0, %arg1 : i32
    %c0_i32 = arith.constant 0 : i32
    %c0_i32_0 = arith.constant 0 : i32
    return %1, %c0_i32 : i32, i32
  }
  func.func @transform_1(%arg0: i32, %arg1: i32) -> (i32, i32) {
    %c1_i32 = arith.constant 1 : i32
    %0 = arith.muli %arg0, %c1_i32 : i32
    %1 = arith.addi %0, %arg1 : i32
    %c0_i32 = arith.constant 0 : i32
    %c0_i32_0 = arith.constant 0 : i32
    return %1, %c0_i32 : i32, i32
  }
  func.func @transform_2(%arg0: i32, %arg1: i32) -> (i32, i32, i32) {
    %c0_i32 = arith.constant 0 : i32
    %c0_i32_0 = arith.constant 0 : i32
    %c0_i32_1 = arith.constant 0 : i32
    return %arg0, %c0_i32, %c0_i32_0 : i32, i32, i32
  }
}

</mosaic_0001>

<bundles_post_ra>
// kernel: tpu_custom_call.1
= control target key start
LH: loop header
LB: loop body
LE: loop exit
PB: predicated region body
PF: predicated region fallthrough
CT: control target
= control target key end

     0   :  { %7 = vsyncpa [#allocation3], 0  ;;  %s275_s0 = inlined_call_operand.hbm [shape: f32[16,128], index: 0, kind: input, shape index: {}]   ;;  %s276_s1 = inlined_call_operand.hbm [shape: f32[16,128], index: 1, kind: input, shape index: {}]   ;;  %s277_s2 = inlined_call_operand.hbm [shape: f32[1,8,128], index: 2, kind: output, shape index: {}]  }
   0x1   :  { %8 = vsyncpa [#allocation6], 0 }
   0x2   :  { %9 = vsyncpa [#allocation4], 0  ;;  %s219_s9 = smov [#allocation2]   ;;  %s147_s13 = scalar_lea.hbm %s275_s0, 256 }
   0x3   :  { %s19_s10 = sshll.u32 %s219_s9, 4  ;;  %p148_p0 = scmp.ne.s32.totalorder %s275_s0, %s147_s13  ;;  %s20_s10 = int_to_ptr.vmem [resolvable:$true] %s19_s10 }
   0x4   :  { %p151_p1 = scmp.lt.u32.totalorder %s147_s13, %s275_s0 }
   0x6   :  { %p153_p2 = pnand %p151_p1, %p148_p0 }
   0x8   :  { %156 = shalt.err (!%p153_p2)
}
   0x9   :  { %s157_s18 = scalar_lea.vmem %s20_s10, 256  ;;  %p162_p4 = scmp.lt.s32.totalorder %s20_s10, %s20_s10 }
   0xa   :  { %p158_p3 = scmp.ne.s32.totalorder %s20_s10, %s157_s18  ;;  %p163_p5 = scmp.lt.s32.totalorder %s157_s18, %s157_s18 }
   0xc   :  { %p164_p6 = por %p163_p5, %p162_p4 }
   0xe   :  { %p165_p7 = pnand %p164_p6, %p158_p3 }
  0x10   :  { %168 = shalt.err (!%p165_p7)
}
  0x11   :  { %s220_s19 = smov 128   ;;  %s221_s20 = smov 8  }
  0x12   :  { %25 = dma.hbm_to_vmem [thread:$0]  %s275_s0, 256, %s20_s10, [#allocation3], %s220_s19, %s220_s19, %s221_s20  }
  0x13   :  { %s222_s23 = smov [#allocation5]   ;;  %s169_s27 = scalar_lea.hbm %s276_s1, 256 }
  0x14   :  { %s35_s24 = sshll.u32 %s222_s23, 4  ;;  %p170_p8 = scmp.ne.s32.totalorder %s276_s1, %s169_s27  ;;  %s36_s24 = int_to_ptr.vmem [resolvable:$true] %s35_s24 }
  0x15   :  { %p173_p9 = scmp.lt.u32.totalorder %s169_s27, %s276_s1 }
  0x17   :  { %p175_p10 = pnand %p173_p9, %p170_p8 }
  0x19   :  { %178 = shalt.err (!%p175_p10)
}
  0x1a   :  { %s179_s4 = scalar_lea.vmem %s36_s24, 256  ;;  %p184_p12 = scmp.lt.s32.totalorder %s36_s24, %s36_s24 }
  0x1b   :  { %p180_p11 = scmp.ne.s32.totalorder %s36_s24, %s179_s4  ;;  %p185_p13 = scmp.lt.s32.totalorder %s179_s4, %s179_s4 }
  0x1d   :  { %p186_p0 = por %p185_p13, %p184_p12 }
  0x1f   :  { %p187_p1 = pnand %p186_p0, %p180_p11 }
  0x21   :  { %190 = shalt.err (!%p187_p1)
}
  0x22   :  { %41 = dma.hbm_to_vmem [thread:$0]  %s276_s1, 256, %s36_s24, [#allocation6], %s220_s19, %s220_s19, %s221_s20  }
  0x23   :  { %213 = dma.done.wait [#allocation3], 256  }
  0x24   :  { %214 = vsyncadd [#allocation3], 4294967040 }
  0x25   :  { %215 = dma.done.wait [#allocation6], 256  }
  0x26   :  { %216 = vsyncadd [#allocation6], 4294967040  ;;  %v57_v0 = vld [vmem:[#allocation2] sm:$0xff]  ;;  %v58_v1 = vld [vmem:[#allocation2 + $0x8] sm:$0xff]  ;;  %s223_s1 = smov [#allocation7]  }
  0x27   :  { %v67_v2 = vand.u32 2147483647, %v57_v0  ;;  %v68_v3 = vand.u32 2147483647, %v58_v1  ;;  %v59_v14 = vld [vmem:[#allocation5] sm:$0xff]  ;;  %v60_v15 = vld [vmem:[#allocation5 + $0x8] sm:$0xff] }
  0x28   :  { %v61_v17 = vmax.f32 %v57_v0, 0.0  ;;  %v63_v18 = vmul.f32 %v59_v14, %v57_v0  ;;  %v62_v21 = vmax.f32 %v58_v1, 0.0  ;;  %v64_v22 = vmul.f32 %v60_v15, %v58_v1  ;;  %s119_s6 = sshll.u32 %s223_s1, 4  ;;  %s120_s6 = int_to_ptr.vmem [resolvable:$true] %s119_s6 }
  0x29   :  { %v69_v4 = vsub.f32 0.0, %v67_v2  ;;  %v70_v5 = vsub.f32 0.0, %v68_v3  ;;  %s191_s7 = scalar_lea.vmem %s120_s6, 128  ;;  %p196_p3 = scmp.lt.s32.totalorder %s120_s6, %s120_s6 }
  0x2a   :  { %v65_v26 = vsub.f32 %v61_v17, %v63_v18  ;;  %v66_v29 = vsub.f32 %v62_v21, %v64_v22  ;;  %p192_p2 = scmp.ne.s32.totalorder %s120_s6, %s191_s7  ;;  %p197_p4 = scmp.lt.s32.totalorder %s191_s7, %s191_s7 }
  0x2b   :  { %v71_v6 = vmul.f32 1.442695, %v69_v4  ;;  %v73_v7 = vmul.f32 1.442695, %v70_v5 }
  0x2c   :  { %p198_p5 = por %p197_p4, %p196_p3 }
  0x2d   :  { %135 = vpow2.f32 %v71_v6 }
  0x2e   :  { %137 = vpow2.f32 %v73_v7  ;;  %p199_p6 = pnand %p198_p5, %p192_p2 }
  0x37   :  { %v136_v8 = vpop.eup %135 }
  0x38   :  { %v138_v9 = vpop.eup %137  ;;  %v75_v10 = vadd.f32 1.0, %v136_v8  ;;  %v78_v12 = vmul.f32 -0.5, %v136_v8  ;;  %v81_v19 = vand.u32 2147483647, %v136_v8 }
  0x39   :  { %v84_v11 = vadd.f32 1.0, %v138_v9  ;;  %v87_v13 = vmul.f32 -0.5, %v138_v9  ;;  %v90_v23 = vand.u32 2147483647, %v138_v9 }
  0x3a   :  { %139 = vlog2.f32 %v75_v10  ;;  %v79_v16 = vadd.f32 1.0, %v78_v12  ;;  %vm82_vm0 = vcmp.lt.f32.partialorder %v81_v19, 0.0004427343 }
  0x3b   :  { %141 = vlog2.f32 %v84_v11  ;;  %v88_v20 = vadd.f32 1.0, %v87_v13  ;;  %vm91_vm1 = vcmp.lt.f32.partialorder %v90_v23, 0.0004427343 }
  0x3c   :  { %v80_v24 = vmul.f32 %v136_v8, %v79_v16 }
  0x3d   :  { %v89_v27 = vmul.f32 %v138_v9, %v88_v20 }
  0x44   :  { %v140_v25 = vpop.eup %139 }
  0x45   :  { %v142_v28 = vpop.eup %141  ;;  %v77_v30 = vmul.f32 0.6931472, %v140_v25 }
  0x46   :  { %v86_v31 = vmul.f32 0.6931472, %v142_v28 }
  0x47   :  { %v83_v32 = vsel %vm82_vm0, %v80_v24, %v77_v30 }
  0x48   :  { %v92_v33 = vsel %vm91_vm1, %v89_v27, %v86_v31  ;;  %v93_v34 = vadd.f32 %v83_v32, %v65_v26 }
  0x49   :  { %v94_v35 = vadd.f32 %v92_v33, %v66_v29 }
  0x4a   :  { %v95_v36 = vsub.f32 0.0, %v93_v34 }
  0x4b   :  { %v96_v37 = vsub.f32 0.0, %v94_v35 }
  0x4c   :  { %v97_v38 = vmul.f32 1.442695, %v95_v36 }
  0x4d   :  { %v99_v39 = vmul.f32 1.442695, %v96_v37 }
  0x4e   :  { %143 = vpow2.f32 %v97_v38 }
  0x4f   :  { %145 = vpow2.f32 %v99_v39 }
  0x58   :  { %v144_v40 = vpop.eup %143 }
  0x59   :  { %v146_v41 = vpop.eup %145  ;;  %v101_v42 = vsub.f32 1.0, %v144_v40 }
  0x5a   :  { %v102_v43 = vsub.f32 1.0, %v146_v41 }
  0x5b   :  { %v103_v44 = vmul.f32 %v101_v42, %v101_v42 }
  0x5c   :  { %v104_v45 = vmul.f32 %v102_v43, %v102_v43 }
  0x5d   :  { %v105_v46 = vmul.f32 1.5, %v103_v44 }
  0x5e   :  { %v106_v47 = vmul.f32 1.5, %v104_v45 }
  0x5f   :  { %v107_v48 = vmul.f32 %v105_v46, %v93_v34 }
  0x60   :  { %v108_v49 = vmul.f32 %v106_v47, %v94_v35 }
  0x62   :  { %v109_v50 = vadd.f32 %v108_v49, %v107_v48 }
  0x64   :  { %112 = vst [vmem:[#allocation7] sm:$0xff] %v109_v50 }
  0x65   :  { %202 = shalt.err (!%p199_p6)
}
  0x66   :  { %s203_s10 = scalar_lea.hbm %s277_s2, 128 }
  0x67   :  { %p204_p7 = scmp.ne.s32.totalorder %s277_s2, %s203_s10  ;;  %p207_p8 = scmp.lt.u32.totalorder %s203_s10, %s277_s2 }
  0x69   :  { %p209_p9 = pnand %p207_p8, %p204_p7 }
  0x6b   :  { %212 = shalt.err (!%p209_p9)
}
  0x6c   :  { %122 = dma.vmem_to_hbm [thread:$0]  %s120_s6, 128, %s277_s2, [#allocation4]  }
  0x6d   :  { %217 = dma.done.wait [#allocation4], 128  }
  0x6e   :  { %218 = vsyncadd [#allocation4], 4294967168 }
  0x6f   :  { %126 = vsyncpa [#allocation3], 1 }
  0x70   :  { %127 = vsyncpa [#allocation6], 1 }
  0x71   :  { %128 = vsyncpa [#allocation4], 1 }

</bundles_post_ra>
